<compile_context>
chip_gen: v5e
topology: v5e:2x2
jax: 0.10.0
libtpu: 0.0.40
codegen_flags: <defaults>
</compile_context>

<pallas_src>
import functools

import jax
import jax.numpy as jnp
from jax.experimental import pallas as pl
from jax.experimental.pallas import tpu as pltpu

BLOCK_SIZE = 16  # `block_size` in the PyTorch module (causal-mask extent); requires T <= 16


def _mha_kernel(x_ref, wqkv_ref, wp_ref, bp_ref, o_ref, *, n_head, head_size):
    """One grid step = one block of `b_blk` batch elements; all heads + softmax + proj fused."""
    b_blk, T, C = x_ref.shape
    HD = n_head * head_size
    cdt = wqkv_ref.dtype  # compute dtype for MXU operands (bf16 on the default path)

    # Fused Q/K/V projection for the whole block: ONE wide MXU matmul, f32 accumulation.
    x = x_ref[...].reshape(b_blk * T, C)
    qkv = jnp.dot(x, wqkv_ref[...], preferred_element_type=jnp.float32)  # (b_blk*T, 3*HD) f32

    # Causal (tril) mask, built once per grid step.
    row = jax.lax.broadcasted_iota(jnp.int32, (T, T), 0)
    col = jax.lax.broadcasted_iota(jnp.int32, (T, T), 1)
    causal = col <= row

    for b in range(b_blk):            # static & small (<=2) -> unrolled
        qkv_b = qkv[b * T:(b + 1) * T, :]
        acc = jnp.zeros((T, C), jnp.float32)
        for h in range(n_head):       # static -> unrolled
            q = qkv_b[:, h * head_size:(h + 1) * head_size].astype(cdt)                # (T, D)
            k = qkv_b[:, HD + h * head_size:HD + (h + 1) * head_size].astype(cdt)      # (T, D)
            v = qkv_b[:, 2 * HD + h * head_size:2 * HD + (h + 1) * head_size].astype(cdt)

            # NOTE: the reference Head does NOT scale scores by 1/sqrt(head_size).
            s = jnp.dot(q, k.T, preferred_element_type=jnp.float32)                    # (T, T)
            s = jnp.where(causal, s, -jnp.inf)

            # softmax over keys (every causal row has >=1 unmasked entry -> no NaN risk)
            m = jnp.max(s, axis=-1, keepdims=True)
            e = jnp.exp(s - m)
            p = e * pl.reciprocal(jnp.sum(e, axis=-1, keepdims=True), approx=True)
            # dropout(p=0.2) on attention weights -> identity (eval mode)

            oh = jnp.dot(p.astype(cdt), v, preferred_element_type=jnp.float32)         # (T, D)
            # Accumulate the output projection per head: eliminates the lane-axis concatenate.
            acc = acc + jnp.dot(oh.astype(cdt),
                                wp_ref[h * head_size:(h + 1) * head_size, :],
                                preferred_element_type=jnp.float32)                    # (T, C)

        y = acc + bp_ref[...]         # bias; final dropout(p=0.2) -> identity (eval mode)
        o_ref[b] = y.astype(o_ref.dtype)


def _fuse_qkv_weights(wq, wk, wv):
    """(H, C, D) per-head weights -> one (C, 3*H*D) matrix: columns [q heads | k heads | v heads]."""
    n_head, C, D = wq.shape

    def flat(w):
        return jnp.transpose(w, (1, 0, 2)).reshape(C, n_head * D)

    return jnp.concatenate([flat(wq), flat(wk), flat(wv)], axis=1)


def multi_head_attention(x, wq, wk, wv, wproj_t, bproj, *, compute_dtype=jnp.bfloat16):
    """x: (B, T, C); wq/wk/wv: (n_head, C, head_size) (pre-transposed per head);
    wproj_t: (n_head*head_size, C) (pre-transposed); bproj: (1, C)."""
    B, T, C = x.shape
    n_head, _, head_size = wq.shape
    HD = n_head * head_size
    assert T <= BLOCK_SIZE

    # Weight fusion + low-precision cast happen once, outside the kernel (plain XLA ops).
    wqkv = _fuse_qkv_weights(wq, wk, wv).astype(compute_dtype)   # (C, 3*HD)
    wp = wproj_t.astype(compute_dtype)                           # (HD, C)
    bp = bproj.astype(jnp.float32)                               # (1, C): added to f32 accumulator
    xk = x.astype(compute_dtype)

    # At most 2 grid steps over the batch: two "parallel" steps map one block per TensorCore on
    # v7x; on single-TC v5e/v6e this costs at most 2 * ~0.35us of per-step pipeline overhead.
    num_blocks = 2 if (B >= 2 and B % 2 == 0) else 1
    b_blk = B // num_blocks

    kernel = functools.partial(_mha_kernel, n_head=n_head, head_size=head_size)

    return pl.pallas_call(
        kernel,
        out_shape=jax.ShapeDtypeStruct((B, T, C), x.dtype),
        grid_spec=pltpu.PrefetchScalarGridSpec(
            num_scalar_prefetch=0,
            grid=(num_blocks,),
            in_specs=[
                pl.BlockSpec((b_blk, T, C), lambda i: (i, 0, 0)),
                # Weights are grid-invariant (index_map always (0, 0)) -> DMA'd only once.
                # TODO(synk): pipeline_mode=pl.Buffered(1) once C/head_size grow enough to matter.
                pl.BlockSpec((C, 3 * HD), lambda i: (0, 0)),
                pl.BlockSpec((HD, C), lambda i: (0, 0)),
                pl.BlockSpec((1, C), lambda i: (0, 0)),
            ],
            out_specs=pl.BlockSpec((b_blk, T, C), lambda i: (i, 0, 0)),
        ),
        compiler_params=pltpu.CompilerParams(
            dimension_semantics=("parallel",),
        ),
    )(xk, wqkv, wp, bp)


def reference_mha(x, wq, wk, wv, wproj_t, bproj):
    """Pure-JAX reference matching the PyTorch forward (dropout in eval mode)."""
    B, T, C = x.shape
    n_head = wq.shape[0]
    mask = jnp.tril(jnp.ones((T, T), dtype=bool))
    outs = []
    for h in range(n_head):
        q = x @ wq[h]
        k = x @ wk[h]
        v = x @ wv[h]
        w = q @ jnp.swapaxes(k, -1, -2)
        w = jnp.where(mask, w, -jnp.inf)
        w = jax.nn.softmax(w, axis=-1)
        outs.append(w @ v)
    cat = jnp.concatenate(outs, axis=-1)
    return cat @ wproj_t + bproj[0]


if __name__ == "__main__":
    # small shapes consistent with the module: T must be <= block_size (=16)
    B, T = 2, BLOCK_SIZE
    n_embed, n_head, head_size = 32, 4, 8

    key = jax.random.PRNGKey(0)
    kx, kq, kk, kv, kp, kb = jax.random.split(key, 6)

    bound_e = 1.0 / jnp.sqrt(n_embed)
    bound_p = 1.0 / jnp.sqrt(n_head * head_size)
    x = jax.random.normal(kx, (B, T, n_embed), dtype=jnp.float32)
    wq = jax.random.uniform(kq, (n_head, n_embed, head_size), jnp.float32, -bound_e, bound_e)
    wk = jax.random.uniform(kk, (n_head, n_embed, head_size), jnp.float32, -bound_e, bound_e)
    wv = jax.random.uniform(kv, (n_head, n_embed, head_size), jnp.float32, -bound_e, bound_e)
    wproj_t = jax.random.uniform(kp, (n_head * head_size, n_embed), jnp.float32, -bound_p, bound_p)
    bproj = jax.random.uniform(kb, (1, n_embed), jnp.float32, -bound_p, bound_p)

    # f32 compute path: near-exact check against the pure-JAX reference
    # (tolerance leaves headroom for the EUP approximate reciprocal in the softmax).
    out_f32 = jax.block_until_ready(
        multi_head_attention(x, wq, wk, wv, wproj_t, bproj, compute_dtype=jnp.float32))
    ref_f32 = reference_mha(x, wq, wk, wv, wproj_t, bproj)
    assert out_f32.shape == (B, T, n_embed)
    assert jnp.allclose(out_f32, ref_f32, atol=5e-3, rtol=5e-3), "f32 kernel mismatch vs reference"

    # bf16 compute path (default; what the perf review recommends for v6e/v7x): compare against
    # the reference evaluated on bf16-rounded inputs, at bf16-level tolerance.
    out_bf16 = jax.block_until_ready(multi_head_attention(x, wq, wk, wv, wproj_t, bproj))
    cast = lambda a: a.astype(jnp.bfloat16).astype(jnp.float32)
    ref_bf16 = reference_mha(cast(x), cast(wq), cast(wk), cast(wv), cast(wproj_t), bproj)
    assert out_bf16.shape == (B, T, n_embed)
    assert jnp.allclose(out_bf16, ref_bf16, atol=5e-2, rtol=5e-2), "bf16 kernel mismatch vs reference"

    print("KERNEL_OK")
</pallas_src>

<mosaic_0001>
module attributes {stable_mosaic.version = 11 : i64} {
  func.func @_mha_kernel(%arg0: i32, %arg1: memref<1x16x32xf32, #tpu.memory_space<vmem>>, %arg2: memref<32x96xf32, #tpu.memory_space<vmem>>, %arg3: memref<32x32xf32, #tpu.memory_space<vmem>>, %arg4: memref<1x32xf32, #tpu.memory_space<vmem>>, %arg5: memref<1x16x32xf32, #tpu.memory_space<vmem>>) attributes {dimension_semantics = [#tpu.dimension_semantics<parallel>], iteration_bounds = array<i64: 2>, scalar_prefetch = 0 : i64, scratch_operands = 0 : i64, tpu.core_type = #tpu.core_type<tc>, window_params = [{transform_indices = @transform_0, window_bounds = array<i64: 1, 16, 32>}, {pipeline_mode = #tpu.pipeline_mode<synchronous>, transform_indices = @transform_1, window_bounds = array<i64: 32, 96>}, {pipeline_mode = #tpu.pipeline_mode<synchronous>, transform_indices = @transform_2, window_bounds = array<i64: 32, 32>}, {pipeline_mode = #tpu.pipeline_mode<synchronous>, transform_indices = @transform_3, window_bounds = array<i64: 1, 32>}, {transform_indices = @transform_4, window_bounds = array<i64: 1, 16, 32>}]} {
    %c0 = arith.constant 0 : index
    %c0_0 = arith.constant 0 : index
    %c0_1 = arith.constant 0 : index
    %0 = vector.load %arg1[%c0, %c0_0, %c0_1] : memref<1x16x32xf32, #tpu.memory_space<vmem>>, vector<1x16x32xf32>
    %1 = vector.shape_cast %0 : vector<1x16x32xf32> to vector<16x32xf32>
    %c0_2 = arith.constant 0 : index
    %c0_3 = arith.constant 0 : index
    %2 = vector.load %arg2[%c0_2, %c0_3] : memref<32x96xf32, #tpu.memory_space<vmem>>, vector<32x96xf32>
    %cst = arith.constant dense<0.000000e+00> : vector<16x96xf32>
    %3 = tpu.matmul %1, %2, %cst {dimension_numbers = #tpu.dot_dimension_numbers<[1], [0], [0], [1], [0, 0, 1, 1], [], []>} : vector<16x32xf32>, vector<32x96xf32>, vector<16x96xf32> -> vector<16x96xf32>
    %4 = tpu.iota {dimensions = array<i32: 0>} : vector<16x16xi32>
    %5 = tpu.iota {dimensions = array<i32: 1>} : vector<16x16xi32>
    %6 = arith.cmpi sle, %5, %4 : vector<16x16xi32>
    %cst_4 = arith.constant 0.000000e+00 : f32
    %7 = vector.broadcast %cst_4 : f32 to vector<16x32xf32>
    %8 = vector.extract_strided_slice %3 {offsets = [0, 0], sizes = [16, 8], strides = [1, 1]} : vector<16x96xf32> to vector<16x8xf32>
    %9 = vector.extract_strided_slice %3 {offsets = [0, 32], sizes = [16, 8], strides = [1, 1]} : vector<16x96xf32> to vector<16x8xf32>
    %10 = vector.extract_strided_slice %3 {offsets = [0, 64], sizes = [16, 8], strides = [1, 1]} : vector<16x96xf32> to vector<16x8xf32>
    %11 = tpu.transpose %9, [1, 0] : vector<16x8xf32> -> vector<8x16xf32>
    %cst_5 = arith.constant dense<0.000000e+00> : vector<16x16xf32>
    %12 = tpu.matmul %8, %11, %cst_5 {dimension_numbers = #tpu.dot_dimension_numbers<[1], [0], [0], [1], [0, 0, 1, 1], [], []>} : vector<16x8xf32>, vector<8x16xf32>, vector<16x16xf32> -> vector<16x16xf32>
    %cst_6 = arith.constant 0xFF800000 : f32
    %13 = vector.broadcast %cst_6 : f32 to vector<16x16xf32>
    %14 = arith.select %6, %12, %13 : vector<16x16xi1>, vector<16x16xf32>
    %cst_7 = arith.constant dense<0xFF800000> : vector<16xf32>
    %15 = vector.multi_reduction <maximumf>, %14, %cst_7 [1] : vector<16x16xf32> to vector<16xf32>
    %16 = vector.shape_cast %15 : vector<16xf32> to vector<16x1xf32>
    %17 = vector.broadcast %16 : vector<16x1xf32> to vector<16x16xf32>
    %18 = arith.subf %14, %17 : vector<16x16xf32>
    %19 = math.exp %18 : vector<16x16xf32>
    %cst_8 = arith.constant dense<0.000000e+00> : vector<16xf32>
    %20 = vector.multi_reduction <add>, %19, %cst_8 [1] : vector<16x16xf32> to vector<16xf32>
    %21 = vector.shape_cast %20 : vector<16xf32> to vector<16x1xf32>
    %22 = tpu.reciprocal %21 {approx = true} : vector<16x1xf32> -> vector<16x1xf32>
    %23 = vector.broadcast %22 : vector<16x1xf32> to vector<16x16xf32>
    %24 = arith.mulf %19, %23 : vector<16x16xf32>
    %cst_9 = arith.constant dense<0.000000e+00> : vector<16x8xf32>
    %25 = tpu.matmul %24, %10, %cst_9 {dimension_numbers = #tpu.dot_dimension_numbers<[1], [0], [0], [1], [0, 0, 1, 1], [], []>} : vector<16x16xf32>, vector<16x8xf32>, vector<16x8xf32> -> vector<16x8xf32>
    %c0_10 = arith.constant 0 : index
    %c0_11 = arith.constant 0 : index
    %26 = vector.load %arg3[%c0_10, %c0_11] : memref<32x32xf32, #tpu.memory_space<vmem>>, vector<8x32xf32>
    %cst_12 = arith.constant dense<0.000000e+00> : vector<16x32xf32>
    %27 = tpu.matmul %25, %26, %cst_12 {dimension_numbers = #tpu.dot_dimension_numbers<[1], [0], [0], [1], [0, 0, 1, 1], [], []>} : vector<16x8xf32>, vector<8x32xf32>, vector<16x32xf32> -> vector<16x32xf32>
    %28 = arith.addf %7, %27 : vector<16x32xf32>
    %29 = vector.extract_strided_slice %3 {offsets = [0, 8], sizes = [16, 8], strides = [1, 1]} : vector<16x96xf32> to vector<16x8xf32>
    %30 = vector.extract_strided_slice %3 {offsets = [0, 40], sizes = [16, 8], strides = [1, 1]} : vector<16x96xf32> to vector<16x8xf32>
    %31 = vector.extract_strided_slice %3 {offsets = [0, 72], sizes = [16, 8], strides = [1, 1]} : vector<16x96xf32> to vector<16x8xf32>
    %32 = tpu.transpose %30, [1, 0] : vector<16x8xf32> -> vector<8x16xf32>
    %cst_13 = arith.constant dense<0.000000e+00> : vector<16x16xf32>
    %33 = tpu.matmul %29, %32, %cst_13 {dimension_numbers = #tpu.dot_dimension_numbers<[1], [0], [0], [1], [0, 0, 1, 1], [], []>} : vector<16x8xf32>, vector<8x16xf32>, vector<16x16xf32> -> vector<16x16xf32>
    %cst_14 = arith.constant 0xFF800000 : f32
    %34 = vector.broadcast %cst_14 : f32 to vector<16x16xf32>
    %35 = arith.select %6, %33, %34 : vector<16x16xi1>, vector<16x16xf32>
    %cst_15 = arith.constant dense<0xFF800000> : vector<16xf32>
    %36 = vector.multi_reduction <maximumf>, %35, %cst_15 [1] : vector<16x16xf32> to vector<16xf32>
    %37 = vector.shape_cast %36 : vector<16xf32> to vector<16x1xf32>
    %38 = vector.broadcast %37 : vector<16x1xf32> to vector<16x16xf32>
    %39 = arith.subf %35, %38 : vector<16x16xf32>
    %40 = math.exp %39 : vector<16x16xf32>
    %cst_16 = arith.constant dense<0.000000e+00> : vector<16xf32>
    %41 = vector.multi_reduction <add>, %40, %cst_16 [1] : vector<16x16xf32> to vector<16xf32>
    %42 = vector.shape_cast %41 : vector<16xf32> to vector<16x1xf32>
    %43 = tpu.reciprocal %42 {approx = true} : vector<16x1xf32> -> vector<16x1xf32>
    %44 = vector.broadcast %43 : vector<16x1xf32> to vector<16x16xf32>
    %45 = arith.mulf %40, %44 : vector<16x16xf32>
    %cst_17 = arith.constant dense<0.000000e+00> : vector<16x8xf32>
    %46 = tpu.matmul %45, %31, %cst_17 {dimension_numbers = #tpu.dot_dimension_numbers<[1], [0], [0], [1], [0, 0, 1, 1], [], []>} : vector<16x16xf32>, vector<16x8xf32>, vector<16x8xf32> -> vector<16x8xf32>
    %c8 = arith.constant 8 : index
    %c0_18 = arith.constant 0 : index
    %47 = vector.load %arg3[%c8, %c0_18] : memref<32x32xf32, #tpu.memory_space<vmem>>, vector<8x32xf32>
    %cst_19 = arith.constant dense<0.000000e+00> : vector<16x32xf32>
    %48 = tpu.matmul %46, %47, %cst_19 {dimension_numbers = #tpu.dot_dimension_numbers<[1], [0], [0], [1], [0, 0, 1, 1], [], []>} : vector<16x8xf32>, vector<8x32xf32>, vector<16x32xf32> -> vector<16x32xf32>
    %49 = arith.addf %28, %48 : vector<16x32xf32>
    %50 = vector.extract_strided_slice %3 {offsets = [0, 16], sizes = [16, 8], strides = [1, 1]} : vector<16x96xf32> to vector<16x8xf32>
    %51 = vector.extract_strided_slice %3 {offsets = [0, 48], sizes = [16, 8], strides = [1, 1]} : vector<16x96xf32> to vector<16x8xf32>
    %52 = vector.extract_strided_slice %3 {offsets = [0, 80], sizes = [16, 8], strides = [1, 1]} : vector<16x96xf32> to vector<16x8xf32>
    %53 = tpu.transpose %51, [1, 0] : vector<16x8xf32> -> vector<8x16xf32>
    %cst_20 = arith.constant dense<0.000000e+00> : vector<16x16xf32>
    %54 = tpu.matmul %50, %53, %cst_20 {dimension_numbers = #tpu.dot_dimension_numbers<[1], [0], [0], [1], [0, 0, 1, 1], [], []>} : vector<16x8xf32>, vector<8x16xf32>, vector<16x16xf32> -> vector<16x16xf32>
    %cst_21 = arith.constant 0xFF800000 : f32
    %55 = vector.broadcast %cst_21 : f32 to vector<16x16xf32>
    %56 = arith.select %6, %54, %55 : vector<16x16xi1>, vector<16x16xf32>
    %cst_22 = arith.constant dense<0xFF800000> : vector<16xf32>
    %57 = vector.multi_reduction <maximumf>, %56, %cst_22 [1] : vector<16x16xf32> to vector<16xf32>
    %58 = vector.shape_cast %57 : vector<16xf32> to vector<16x1xf32>
    %59 = vector.broadcast %58 : vector<16x1xf32> to vector<16x16xf32>
    %60 = arith.subf %56, %59 : vector<16x16xf32>
    %61 = math.exp %60 : vector<16x16xf32>
    %cst_23 = arith.constant dense<0.000000e+00> : vector<16xf32>
    %62 = vector.multi_reduction <add>, %61, %cst_23 [1] : vector<16x16xf32> to vector<16xf32>
    %63 = vector.shape_cast %62 : vector<16xf32> to vector<16x1xf32>
    %64 = tpu.reciprocal %63 {approx = true} : vector<16x1xf32> -> vector<16x1xf32>
    %65 = vector.broadcast %64 : vector<16x1xf32> to vector<16x16xf32>
    %66 = arith.mulf %61, %65 : vector<16x16xf32>
    %cst_24 = arith.constant dense<0.000000e+00> : vector<16x8xf32>
    %67 = tpu.matmul %66, %52, %cst_24 {dimension_numbers = #tpu.dot_dimension_numbers<[1], [0], [0], [1], [0, 0, 1, 1], [], []>} : vector<16x16xf32>, vector<16x8xf32>, vector<16x8xf32> -> vector<16x8xf32>
    %c16 = arith.constant 16 : index
    %c0_25 = arith.constant 0 : index
    %68 = vector.load %arg3[%c16, %c0_25] : memref<32x32xf32, #tpu.memory_space<vmem>>, vector<8x32xf32>
    %cst_26 = arith.constant dense<0.000000e+00> : vector<16x32xf32>
    %69 = tpu.matmul %67, %68, %cst_26 {dimension_numbers = #tpu.dot_dimension_numbers<[1], [0], [0], [1], [0, 0, 1, 1], [], []>} : vector<16x8xf32>, vector<8x32xf32>, vector<16x32xf32> -> vector<16x32xf32>
    %70 = arith.addf %49, %69 : vector<16x32xf32>
    %71 = vector.extract_strided_slice %3 {offsets = [0, 24], sizes = [16, 8], strides = [1, 1]} : vector<16x96xf32> to vector<16x8xf32>
    %72 = vector.extract_strided_slice %3 {offsets = [0, 56], sizes = [16, 8], strides = [1, 1]} : vector<16x96xf32> to vector<16x8xf32>
    %73 = vector.extract_strided_slice %3 {offsets = [0, 88], sizes = [16, 8], strides = [1, 1]} : vector<16x96xf32> to vector<16x8xf32>
    %74 = tpu.transpose %72, [1, 0] : vector<16x8xf32> -> vector<8x16xf32>
    %cst_27 = arith.constant dense<0.000000e+00> : vector<16x16xf32>
    %75 = tpu.matmul %71, %74, %cst_27 {dimension_numbers = #tpu.dot_dimension_numbers<[1], [0], [0], [1], [0, 0, 1, 1], [], []>} : vector<16x8xf32>, vector<8x16xf32>, vector<16x16xf32> -> vector<16x16xf32>
    %cst_28 = arith.constant 0xFF800000 : f32
    %76 = vector.broadcast %cst_28 : f32 to vector<16x16xf32>
    %77 = arith.select %6, %75, %76 : vector<16x16xi1>, vector<16x16xf32>
    %cst_29 = arith.constant dense<0xFF800000> : vector<16xf32>
    %78 = vector.multi_reduction <maximumf>, %77, %cst_29 [1] : vector<16x16xf32> to vector<16xf32>
    %79 = vector.shape_cast %78 : vector<16xf32> to vector<16x1xf32>
    %80 = vector.broadcast %79 : vector<16x1xf32> to vector<16x16xf32>
    %81 = arith.subf %77, %80 : vector<16x16xf32>
    %82 = math.exp %81 : vector<16x16xf32>
    %cst_30 = arith.constant dense<0.000000e+00> : vector<16xf32>
    %83 = vector.multi_reduction <add>, %82, %cst_30 [1] : vector<16x16xf32> to vector<16xf32>
    %84 = vector.shape_cast %83 : vector<16xf32> to vector<16x1xf32>
    %85 = tpu.reciprocal %84 {approx = true} : vector<16x1xf32> -> vector<16x1xf32>
    %86 = vector.broadcast %85 : vector<16x1xf32> to vector<16x16xf32>
    %87 = arith.mulf %82, %86 : vector<16x16xf32>
    %cst_31 = arith.constant dense<0.000000e+00> : vector<16x8xf32>
    %88 = tpu.matmul %87, %73, %cst_31 {dimension_numbers = #tpu.dot_dimension_numbers<[1], [0], [0], [1], [0, 0, 1, 1], [], []>} : vector<16x16xf32>, vector<16x8xf32>, vector<16x8xf32> -> vector<16x8xf32>
    %c24 = arith.constant 24 : index
    %c0_32 = arith.constant 0 : index
    %89 = vector.load %arg3[%c24, %c0_32] : memref<32x32xf32, #tpu.memory_space<vmem>>, vector<8x32xf32>
    %cst_33 = arith.constant dense<0.000000e+00> : vector<16x32xf32>
    %90 = tpu.matmul %88, %89, %cst_33 {dimension_numbers = #tpu.dot_dimension_numbers<[1], [0], [0], [1], [0, 0, 1, 1], [], []>} : vector<16x8xf32>, vector<8x32xf32>, vector<16x32xf32> -> vector<16x32xf32>
    %91 = arith.addf %70, %90 : vector<16x32xf32>
    %c0_34 = arith.constant 0 : index
    %c0_35 = arith.constant 0 : index
    %92 = vector.load %arg4[%c0_34, %c0_35] : memref<1x32xf32, #tpu.memory_space<vmem>>, vector<1x32xf32>
    %93 = vector.broadcast %92 : vector<1x32xf32> to vector<16x32xf32>
    %94 = arith.addf %91, %93 : vector<16x32xf32>
    %c0_36 = arith.constant 0 : index
    %c0_37 = arith.constant 0 : index
    %c0_38 = arith.constant 0 : index
    %95 = vector.load %arg5[%c0_36, %c0_37, %c0_38] : memref<1x16x32xf32, #tpu.memory_space<vmem>>, vector<1x16x32xf32>
    %96 = vector.shape_cast %95 : vector<1x16x32xf32> to vector<16x32xf32>
    %97 = vector.shape_cast %94 : vector<16x32xf32> to vector<1x16x32xf32>
    tpu.vector_store %arg5[%c0_36, %c0_37, %c0_38], %97 {strides = array<i32>} : memref<1x16x32xf32, #tpu.memory_space<vmem>>, vector<1x16x32xf32>,
    return
  }
  func.func @transform_0(%arg0: i32) -> (i32, i32, i32) {
    %c0_i32 = arith.constant 0 : i32
    %c0_i32_0 = arith.constant 0 : i32
    %c0_i32_1 = arith.constant 0 : i32
    return %arg0, %c0_i32, %c0_i32_0 : i32, i32, i32
  }
  func.func @transform_1(%arg0: i32) -> (i32, i32) {
    %c0_i32 = arith.constant 0 : i32
    %c0_i32_0 = arith.constant 0 : i32
    %c0_i32_1 = arith.constant 0 : i32
    return %c0_i32, %c0_i32_0 : i32, i32
  }
  func.func @transform_2(%arg0: i32) -> (i32, i32) {
    %c0_i32 = arith.constant 0 : i32
    %c0_i32_0 = arith.constant 0 : i32
    %c0_i32_1 = arith.constant 0 : i32
    return %c0_i32, %c0_i32_0 : i32, i32
  }
  func.func @transform_3(%arg0: i32) -> (i32, i32) {
    %c0_i32 = arith.constant 0 : i32
    %c0_i32_0 = arith.constant 0 : i32
    %c0_i32_1 = arith.constant 0 : i32
    return %c0_i32, %c0_i32_0 : i32, i32
  }
  func.func @transform_4(%arg0: i32) -> (i32, i32, i32) {
    %c0_i32 = arith.constant 0 : i32
    %c0_i32_0 = arith.constant 0 : i32
    %c0_i32_1 = arith.constant 0 : i32
    return %arg0, %c0_i32, %c0_i32_0 : i32, i32, i32
  }
}

</mosaic_0001>

<bundles_post_ra>
// kernel: tpu_custom_call.1
= control target key start
LH: loop header
LB: loop body
LE: loop exit
PB: predicated region body
PF: predicated region fallthrough
CT: control target
= control target key end

     0   :  { %9 = vsyncpa [#allocation3], 0  ;;  %s1605_s0 = inlined_call_operand.hbm [shape: f32[2,16,32], index: 0, kind: input, shape index: {}]   ;;  %s1606_s1 = inlined_call_operand.hbm [shape: f32[32,96], index: 1, kind: input, shape index: {}]   ;;  %s1607_s2 = inlined_call_operand.hbm [shape: f32[32,32], index: 2, kind: input, shape index: {}]   ;;  %s1608_s3 = inlined_call_operand.vmem [shape: f32[1,32], index: 3, kind: input, shape index: {}]   ;;  %s1609_s4 = inlined_call_operand.hbm [shape: f32[2,16,32], index: 4, kind: output, shape index: {}]  }
   0x1   :  { %11 = vsyncpa [#allocation3 + $0x1], 0 }
   0x2   :  { %12 = vsyncpa [#allocation6], 0 }
   0x3   :  { %13 = vsyncpa [#allocation4], 0 }
   0x4   :  { %15 = vsyncpa [#allocation4 + $0x1], 0  ;;  %s1321_s15 = smov 0   ;;  %s1323_s16 = smov 0  }
   0x5   :  { %s1325_s17 = smov 0   ;;  %s1327_s18 = smov 0  }
   0x6 LB: > { %s1342_s19 = sadd.s32 4294967295, %s1277_s18   ;;  %s926_s20 = sadd.s32 4294967294, %s1277_s18   ;;  %s1277_s18 = sphi %s1327_s18, %s1619_s18   ;;  %s1273_s17 = sphi %s1325_s17, %s1618_s17   ;;  %s1269_s16 = sphi %s1323_s16, %s1617_s16   ;;  %s1265_s15 = sphi %s1321_s15, %s1616_s15  }
   0x7   : > { %p41_p0 = scmp.ne.s32.totalorder %s1269_s16, %s1265_s15  ;;  %p42_p1 = scmp.eq.s32.totalorder %s1342_s19, 0 }
   0x8   : > { %p128_p2 = scmp.eq.s32.totalorder %s1342_s19, 1  ;;  %p134_p3 = scmp.eq.s32.totalorder %s926_s20, 1 }
   0x9   : > { %p1351_p4 = por %p42_p1, %p41_p0  ;;  %p927_p5 = scmp.ge.s32.totalorder %s1277_s18, 1 }
   0xa   : > { %p1356_p6 = por %p134_p3, %p41_p0  ;;  %p141_p7 = scmp.lt.s32.totalorder %s1277_s18, 3 }
   0xb   : > { %s152_s25 = sshll.u32 %s1606_s1, 4  ;;  %s1279_s27 = smov [#allocation5]   ;;  %s153_s25 = int_to_ptr.hbm [resolvable:$true] %s152_s25 }
   0xc   : > { %p1364_p8 = pnand %p927_p5, %p141_p7  ;;  %s154_s28 = sshll.u32 %s1279_s27, 4  ;;  %s155_s28 = int_to_ptr.vmem [resolvable:$true] %s154_s28 }
   0xd   : > { %s166_s5 = sshll.u32 %s1607_s2, 4  ;;  %s1280_s6 = smov 128   ;;  %s167_s5 = int_to_ptr.hbm [resolvable:$true] %s166_s5 }
   0xe   : > { %p994_p9 = pneg %p1364_p8  ;;  %s1281_s7 = smov 8  }
   0xf   : > { %s1282_s8 = smov [#allocation7]   ;;  %s1383_s10 = sadd.s32 1, %s1277_s18  }
  0x10   : > { %p995_p10 = pnand %p994_p9, %p42_p1  ;;  %s168_s9 = sshll.u32 %s1282_s8, 4  ;;  %s169_s9 = int_to_ptr.vmem [resolvable:$true] %s168_s9 }
  0x11   : > { %s28_s11 = sadd.s32 1, %s1273_s17  ;;  %s25_s12 = ssub.s32 %s1277_s18, %s1383_s10 }
  0x12   : > { %997 = dma.hbm_to_vmem [thread:$0]  (!%p995_p10), %s153_s25, 512, %s155_s28, [#allocation6], %s1280_s6, %s1280_s6, %s1281_s7  }
  0x13   : > { %1000 = dma.hbm_to_vmem [thread:$0]  (!%p995_p10), %s167_s5, 512, %s169_s9, [#allocation6], %s1280_s6, %s1280_s6, %s1281_s7  }
  0x14   : > { %p35_p12 = scmp.ne.s32.totalorder %s1273_s17, %s1269_s16  ;;  %p26_p13 = scmp.eq.s32.totalorder %s25_s12, 0 }
  0x15   : > { %p36_p0 = scmp.eq.s32.totalorder %s1277_s18, 0  ;;  %p1011_p5 = scmp.lt.s32.totalorder %s1277_s18, 2 }
  0x16   : > { %p1393_p3 = por %p128_p2, %p35_p12  ;;  %s185_s20 = sand.u32 1, %s1273_s17  }
  0x17   : > { %s1399_s14 = scalar_select %p26_p13, %s1273_s17, %s28_s11  }
  0x18   : > { %p37_p7 = por %p36_p0, %p35_p12  ;;  %s931_s23 = sshll.u32 %s185_s20, 4 }
  0x19   : > { %s978_s24 = sshll.u32 %s1277_s18, 4  ;;  %s189_s29 = scalar_lea.vmem [#allocation2], %s931_s23 }
  0x1a   : > { %s194_s28 = scalar_lea.hbm %s1605_s0, %s978_s24  ;;  %s197_s30 = sshll.u32 %s189_s29, 4  ;;  %s198_s30 = int_to_ptr.vmem [resolvable:$true] %s197_s30 }
  0x1b   : > { %s195_s5 = sshll.u32 %s194_s28, 4  ;;  %p1406_p2 = pnand %p1011_p5, %p37_p7  ;;  %s196_s5 = int_to_ptr.hbm [resolvable:$true] %s195_s5 }
  0x1c   : > { %s186_s9 = scalar_lea.sflag [#allocation3], %s185_s20  ;;  %s1177_s11 = sshra.s32 %s196_s5, 4  ;;  %s1178_s11 = int_to_ptr.hbm [resolvable:$true] %s1177_s11 }
  0x1d   : > { %s1179_s12 = scalar_lea.hbm %s1178_s11, 16  ;;  %p1181_p10 = pneg %p1406_p2 }
  0x1e   : > { %p1180_p9 = scmp.ne.s32.totalorder %s1178_s11, %s1179_s12  ;;  %s1184_s25 = scalar_lea.hbm %s1605_s0, 32 }
  0x1f   : > { %p1185_p0 = scmp.lt.s32.totalorder %s1178_s11, %s1605_s0  ;;  %p1186_p5 = scmp.lt.s32.totalorder %s1184_s25, %s1179_s12 }
  0x20   : > { %p1182_p12 = pnand %p1181_p10, %p1180_p9 }
  0x21   : > { %p1187_p7 = por %p1186_p5, %p1185_p0 }
  0x22   : > { %p1183_p13 = pneg %p1182_p12 }
  0x24   : > { %p1188_p11 = pnand %p1187_p7, %p1183_p13 }
  0x26   : > { %1191 = shalt.err (!%p1188_p11)
}
  0x27   : > { %1004 = dma.hbm_to_vmem [thread:$0]  (!%p1406_p2), %s196_s5, 256, %s198_s30, %s186_s9, %s1280_s6, %s1280_s6, %s1281_s7  }
  0x28   : > { %209 = sbr.rel (%p1364_p8) target bundleno = 1526 (0x5f6), region = 36  ;;  %s1426_s20 = sand.u32 (!%p1364_p8), 1, %s1269_s16  }
  0x29   : > { %s935_s29 = sshll.u32 (!%p1364_p8), %s1426_s20, 4  ;;  %s212_s11 = scalar_lea.sflag (!%p1364_p8), [#allocation3], %s1426_s20 }
  0x2a   : > { %s215_s12 = scalar_lea.vmem (!%p1364_p8), [#allocation2], %s935_s29 }
  0x2d   : > { %1252 = dma.done.wait (%p1351_p4), %s212_s11, 256  }
  0x2e   : > { %1254 = vsyncadd (%p1351_p4), %s212_s11, 4294967040 }
  0x2f   : > { %1256 = dma.done.wait (%p42_p1), [#allocation6], 1024  }
  0x30   : > { %1258 = vsyncadd (%p42_p1), [#allocation6], 4294966272  ;;  %v256_v0 = vld [vmem:[#allocation5 + $0x18] sm:$0xff]  ;;  %v255_v1 = vld [vmem:[#allocation5 + $0x10] sm:$0xff]  ;;  %vm257_vm0 = vcmask 261120   ;;  %s1283_s21 = smov 96   ;;  %v287_v14 = vlaneseq }
  0x31   : > { %276 = vmatpush.msra.mxu0 %v256_v0  ;;  %v254_v2 = vld [vmem:[#allocation5 + $0x8] sm:$0xff]  ;;  %v253_v3 = vld [vmem:[#allocation5] sm:$0xff]  ;;  %s1284_s26 = smov 64   ;;  %s1285_s6 = smov 120   ;;  %vm300_vm1 = vcmask 64512   ;;  %vm334_vm3 = vcmask 130048  }
  0x32   : > { %v251_v4 = vld [vmem:[%s215_s12] sm:$0xff]  ;;  %v252_v5 = vld [vmem:[%s215_s12 + $0x8] sm:$0xff]  ;;  %s1286_s7 = smov 80   ;;  %s1287_s30 = smov 72   ;;  %v1467_v15 = vshrl.u32 %v287_v14, 7  ;;  %v1469_v16 = vand.u32 127, %v287_v14 }
  0x33   : > { %277 = vmatpush.msra.mxu0 %v255_v1  ;;  %s1288_s5 = smov 112   ;;  %s1289_s8 = smov 88   ;;  %v392_v35 = vld [vmem:[#allocation7] sm:$0xff] }
  0x34   : > { %vm292_vm2 = vcmp.le.s32.totalorder %v1469_v16, %v1467_v15  ;;  %v1478_v20 = vadd.s32 8, %v1467_v15  ;;  %s1290_s9 = smov 104   ;;  %s1291_s24 = smov 56  }
  0x35   : > { %278 = vmatpush.msra.mxu0 %v254_v2  ;;  %s1292_s23 = smov 48   ;;  %s1293_s25 = smov 40  }
  0x36   : > { %vm293_vm4 = vcmp.le.s32.totalorder %v1469_v16, %v1478_v20  ;;  %s979_s11 = sshll.u32 %s1342_s19, 4  ;;  %s819_s19 = scalar_lea.sflag [#allocation4], %s1426_s20 }
  0x37   : > { %279 = vmatpush.msra.mxu0 %v253_v3 }
  0x38   : > { %939 = vmatmul.msk.f32.vlgmr.msra.gmra.mxu0 %vm257_vm0, %v251_v4 }
  0x40   : > { %940 = vmatmul.msk.f32.gmra.mxu0 %vm257_vm0, %v252_v5 }
  0xb5   : > { %v1442_v6 = vpop.f32.mrf.mxu0 }
  0xbd   : > { %v1444_v7 = vpop.f32.mrf.mxu0 }
  0xbe   : > { %298 = vrot.lane.b32.xlu0 %v1444_v7, %s1283_s21  ;;  %v1450_v8 = vpack.i.bf16 %v1442_v6, %v1444_v7 }
  0xc6   : > { %296 = vrot.lane.b32.xlu0 %v1442_v6, %s1283_s21 }
  0xce   : > { %1065 = vrot.lane.b32.xlu0 %v1450_v8, %s1284_s26  ;;  %s830_s26 = scalar_lea.hbm %s1609_s4, %s979_s11 }
  0xd6   : > { %393 = vrot.lane.b32.xlu0 %v1442_v6, %s1285_s6 }
  0xde   : > { %395 = vrot.lane.b32.xlu0 %v1444_v7, %s1285_s6  ;;  %s250_s6 = scalar_lea.vmem [#allocation8], %s935_s29 }
  0xe6   : > { %556 = vrot.lane.b32.xlu0 %v1444_v7, %s1286_s7 }
  0xee   : > { %684 = vrot.lane.b32.xlu0 %v1442_v6, %s1287_s30 }
  0xf6   : > { %552 = vrot.lane.b32.xlu0 %v1444_v7, %s1288_s5 }
 0x130   : > { %v299_v9 = vpop.permute.xlu0 %298 }
 0x131   : > { %941 = vmatpush.xpose.msk.msra.mxu1 %vm300_vm1, %v299_v9 }
 0x138   : > { %v297_v10 = vpop.permute.xlu0 %296 }
 0x139   : > { %942 = vmatpush.xpose.msk.msra.mxu1 %vm300_vm1, %v297_v10 }
 0x13c   : > { %943 = vmatmul.msk.f32.vlgmr.msra.gmra.mxu1 %vm300_vm1, %v1442_v6 }
 0x13d   : > { %542 = vmatpush.msrb.mxu1 %v392_v35 }
 0x140   : > { %v1066_v11 = vpop.permute.xlu0 %1065 }
 0x141   : > { %v1067_v12 = vunpack.i.l.bf16 %v1066_v11  ;;  %v1068_v13 = vunpack.i.h.bf16 %v1066_v11 }
 0x143   : > { %383 = vmatpush.msrb.mxu0 %v1067_v12  ;;  %980 = vmatpush.msra.mxu2 %v1067_v12 }
 0x144   : > { %944 = vmatmul.msk.f32.gmra.mxu1 %vm300_vm1, %v1444_v7 }
 0x145   : > { %384 = vmatpush.msrb.mxu0 %v1068_v13  ;;  %981 = vmatpush.msra.mxu2 %v1068_v13 }
 0x148   : > { %v394_v36 = vpop.permute.xlu0 %393 }
 0x150   : > { %v396_v39 = vpop.permute.xlu0 %395 }
 0x158   : > { %v557_v45 = vpop.permute.xlu0 %556 }
 0x160   : > { %v685_v48 = vpop.permute.xlu0 %684 }
 0x168   : > { %v553_v50 = vpop.permute.xlu0 %552 }
 0x1b9   : > { %v326_v17 = vpop.f32.mrf.mxu1 }
 0x1ba   : > { %v332_v18 = vsel %vm292_vm2, %v326_v17, -inf }
 0x1bb   : > { %v335_v19 = vsel %vm334_vm3, %v332_v18, -inf }
 0x1bc   : > { %336 = vmax.xlane.f32.xlu1 %v335_v19 }
 0x1c1   : > { %v329_v21 = vpop.f32.mrf.mxu1 }
 0x1c2   : > { %v333_v22 = vsel %vm293_vm4, %v329_v21, -inf }
 0x1c3   : > { %v338_v23 = vsel %vm334_vm3, %v333_v22, -inf }
 0x1c4   : > { %339 = vmax.xlane.f32.xlu1 %v338_v23 }
 0x1dd   : > { %399 = vrot.lane.b32.xlu1 %v1444_v7, %s1289_s8 }
 0x1e5   : > { %554 = vrot.lane.b32.xlu1 %v1442_v6, %s1286_s7  ;;  %s831_s7 = sshll.u32 %s250_s6, 4  ;;  %s832_s7 = int_to_ptr.vmem [resolvable:$true] %s831_s7 }
 0x1ed   : > { %680 = vrot.lane.b32.xlu1 %v1442_v6, %s1290_s9 }
 0x22f   : > { %v337_v24 = vpop.xlane.xlu1 %336 }
 0x230   : > { %v341_v25 = vsub.f32 %v332_v18, %v337_v24 }
 0x232   : > { %v343_v26 = vmul.f32 1.442695, %v341_v25 }
 0x234   : > { %1085 = vpow2.f32 %v343_v26 }
 0x237   : > { %v340_v27 = vpop.xlane.xlu1 %339 }
 0x238   : > { %v342_v28 = vsub.f32 %v333_v22, %v340_v27 }
 0x23a   : > { %v1086_v29 = vpop.eup %1085  ;;  %v345_v30 = vmul.f32 1.442695, %v342_v28 }
 0x23b   : > { %v347_v31 = vsel %vm334_vm3, %v1086_v29, 0.0 }
 0x23c   : > { %1087 = vpow2.f32 %v345_v30  ;;  %348 = vadd.xlane.f32.xlu2 %v347_v31 }
 0x242   : > { %v1088_v32 = vpop.eup %1087 }
 0x243   : > { %v350_v33 = vsel %vm334_vm3, %v1088_v32, 0.0 }
 0x244   : > { %351 = vadd.xlane.f32.xlu2 %v350_v33 }
 0x24f   : > { %v400_v34 = vpop.permute.xlu1 %399 }
 0x250   : > { %947 = vmatpush.xpose.msk.msra.mxu3 %vm300_vm1, %v400_v34 }
 0x257   : > { %v555_v46 = vpop.permute.xlu1 %554 }
 0x25c   : > { %397 = vrot.lane.b32.xlu2 %v1442_v6, %s1289_s8 }
 0x25f   : > { %v681_v56 = vpop.permute.xlu1 %680 }
 0x264   : > { %686 = vrot.lane.b32.xlu2 %v1444_v7, %s1287_s30  ;;  %s833_s30 = sshll.u32 %s830_s26, 4  ;;  %s834_s30 = int_to_ptr.hbm [resolvable:$true] %s833_s30 }
 0x26c   : > { %550 = vrot.lane.b32.xlu2 %v1442_v6, %s1288_s5  ;;  %s1221_s5 = sshra.s32 %s834_s30, 4  ;;  %s1222_s5 = int_to_ptr.hbm [resolvable:$true] %s1221_s5 }
 0x26d   : > { %s1223_s8 = scalar_lea.hbm %s1222_s5, 16  ;;  %p1228_p11 = scmp.lt.s32.totalorder %s1222_s5, %s1609_s4 }
 0x26e   : > { %p1224_p1 = scmp.ne.s32.totalorder %s1222_s5, %s1223_s8 }
 0x270   : > { %p1225_p4 = pnand %p1224_p1, %p1393_p3 }
 0x272   : > { %p1226_p8 = pneg %p1225_p4 }
 0x274   : > { %682 = vrot.lane.b32.xlu2 %v1444_v7, %s1290_s9 }
 0x2af   : > { %v349_v37 = vpop.xlane.xlu2 %348 }
 0x2b0   : > { %1089 = vrcp.f32 %v349_v37 }
 0x2b6   : > { %v1090_v38 = vpop.eup %1089 }
 0x2b7   : > { %v352_v40 = vpop.xlane.xlu2 %351  ;;  %v355_v41 = vmul.f32 %v1090_v38, %v1086_v29 }
 0x2b8   : > { %1091 = vrcp.f32 %v352_v40 }
 0x2b9   : > { %945 = vmatmul.msk.f32.vlgmr.msrb.gmra.mxu0 %vm334_vm3, %v355_v41 }
 0x2be   : > { %v1092_v42 = vpop.eup %1091 }
 0x2bf   : > { %v398_v43 = vpop.permute.xlu2 %397  ;;  %v356_v44 = vmul.f32 %v1092_v42, %v1088_v32 }
 0x2c0   : > { %948 = vmatpush.xpose.msk.msra.mxu3 %vm300_vm1, %v398_v43 }
 0x2c1   : > { %946 = vmatmul.msk.f32.vlgmr.msra.gmra.mxu2 %vm334_vm3, %v356_v44 }
 0x2c3   : > { %949 = vmatmul.msk.f32.vlgmr.msra.gmra.mxu3 %vm300_vm1, %v394_v36 }
 0x2c4   : > { %957 = vmatpush.xpose.msk.msrb.mxu3 %vm300_vm1, %v557_v45 }
 0x2c7   : > { %v687_v47 = vpop.permute.xlu2 %686 }
 0x2c8   : > { %958 = vmatpush.xpose.msk.msrb.mxu3 %vm300_vm1, %v555_v46  ;;  %965 = vmatpush.xpose.msk.msra.mxu1 %vm300_vm1, %v687_v47 }
 0x2cb   : > { %950 = vmatmul.msk.f32.gmra.mxu3 %vm300_vm1, %v396_v39 }
 0x2cc   : > { %966 = vmatpush.xpose.msk.msra.mxu1 %vm300_vm1, %v685_v48 }
 0x2cf   : > { %v551_v49 = vpop.permute.xlu2 %550 }
 0x2d3   : > { %959 = vmatmul.msk.f32.vlgmr.msrb.gmra.mxu3 %vm300_vm1, %v551_v49 }
 0x2d7   : > { %v683_v60 = vpop.permute.xlu2 %682 }
 0x2db   : > { %960 = vmatmul.msk.f32.gmra.mxu3 %vm300_vm1, %v553_v50 }
 0x336   : > { %v386_v51 = vpop.f32.mrf.mxu0 }
 0x337   : > { %955 = vmatmul.msk.f32.vlgmr.msrb.gmra.mxu1 %vm300_vm1, %v386_v51 }
 0x344   : > { %v389_v52 = vpop.f32.mrf.mxu2 }
 0x345   : > { %956 = vmatmul.msk.f32.gmra.mxu1 %vm300_vm1, %v389_v52 }
 0x346   : > { %v426_v53 = vpop.f32.mrf.mxu3 }
 0x347   : > { %v432_v54 = vsel %vm292_vm2, %v426_v53, -inf }
 0x348   : > { %v434_v55 = vsel %vm334_vm3, %v432_v54, -inf }
 0x349   : > { %435 = vmax.xlane.f32.xlu1 %v434_v55 }
 0x34d   : > { %967 = vmatmul.msk.f32.vlgmr.msra.gmra.mxu1 %vm300_vm1, %v681_v56 }
 0x34e   : > { %v429_v57 = vpop.f32.mrf.mxu3 }
 0x34f   : > { %v433_v58 = vsel %vm293_vm4, %v429_v57, -inf  ;;  %v491_v57 = vld [vmem:[#allocation7 + $0x8] sm:$0xff] }
 0x350   : > { %v437_v59 = vsel %vm334_vm3, %v433_v58, -inf  ;;  %513 = vmatpush.msra.mxu0 %v491_v57 }
 0x351   : > { %438 = vmax.xlane.f32.xlu0 %v437_v59  ;;  %v648_v59 = vld [vmem:[#allocation7 + $0x10] sm:$0xff] }
 0x352   : > { %670 = vmatpush.msrb.mxu0 %v648_v59 }
 0x355   : > { %968 = vmatmul.msk.f32.gmra.mxu1 %vm300_vm1, %v683_v60 }
 0x356   : > { %v583_v61 = vpop.f32.mrf.mxu3 }
 0x357   : > { %v589_v62 = vsel %vm292_vm2, %v583_v61, -inf }
 0x358   : > { %v591_v63 = vsel %vm334_vm3, %v589_v62, -inf }
 0x359   : > { %592 = vmax.xlane.f32.xlu1 %v591_v63 }
 0x35e   : > { %v586_v0 = vpop.f32.mrf.mxu3 }
 0x35f   : > { %v590_v1 = vsel %vm293_vm4, %v586_v0, -inf }
 0x360   : > { %v594_v2 = vsel %vm334_vm3, %v590_v1, -inf }
 0x361   : > { %595 = vmax.xlane.f32.xlu0 %v594_v2 }
 0x3b4   : > { %v1530_v3 = vpop.f32.mrf.mxu1 }
 0x3bc   : > { %v436_v4 = vpop.xlane.xlu1 %435 }
 0x3bd   : > { %v440_v5 = vsub.f32 %v432_v54, %v436_v4 }
 0x3bf   : > { %v442_v6 = vmul.f32 1.442695, %v440_v5 }
 0x3c1   : > { %1093 = vpow2.f32 %v442_v6 }
 0x3c2   : > { %v1532_v7 = vpop.f32.mrf.mxu1 }
 0x3c4   : > { %v439_v9 = vpop.xlane.xlu0 %438 }
 0x3c5   : > { %v441_v10 = vsub.f32 %v433_v58, %v439_v9 }
 0x3c7   : > { %v1094_v11 = vpop.eup %1093  ;;  %v444_v12 = vmul.f32 1.442695, %v441_v10 }
 0x3c8   : > { %v446_v13 = vsel %vm334_vm3, %v1094_v11, 0.0 }
 0x3c9   : > { %1095 = vpow2.f32 %v444_v12  ;;  %447 = vadd.xlane.f32.xlu1 %v446_v13  ;;  %v778_v12 = vld [vmem:[#allocation7 + $0x18] sm:$0xff] }
 0x3ca   : > { %v713_v14 = vpop.f32.mrf.mxu1 }
 0x3cb   : > { %v719_v17 = vsel %vm292_vm2, %v713_v14, -inf }
 0x3cc   : > { %v593_v18 = vpop.xlane.xlu1 %592  ;;  %v721_v19 = vsel %vm334_vm3, %v719_v17, -inf }
 0x3cd   : > { %v597_v21 = vsub.f32 %v589_v62, %v593_v18  ;;  %722 = vmax.xlane.f32.xlu2 %v721_v19 }
 0x3cf   : > { %v1096_v22 = vpop.eup %1095  ;;  %v599_v23 = vmul.f32 1.442695, %v597_v21 }
 0x3d0   : > { %v449_v24 = vsel %vm334_vm3, %v1096_v22, 0.0 }
 0x3d1   : > { %1097 = vpow2.f32 %v599_v23  ;;  %450 = vadd.xlane.f32.xlu0 %v449_v24  ;;  %v1084_v24 = vld [vmem:[%s1608_s3] ss:$0 sm:$0xff] }
 0x3d2   : > { %v716_v25 = vpop.f32.mrf.mxu1 }
 0x3d3   : > { %v720_v26 = vsel %vm293_vm4, %v716_v25, -inf }
 0x3d4   : > { %v724_v27 = vsel %vm334_vm3, %v720_v26, -inf  ;;  %v596_v32 = vpop.xlane.xlu0 %595 }
 0x3d5   : > { %725 = vmax.xlane.f32.xlu2 %v724_v27  ;;  %v598_v34 = vsub.f32 %v590_v1, %v596_v32 }
 0x3d7   : > { %v1098_v15 = vpop.eup %1097  ;;  %v601_v38 = vmul.f32 1.442695, %v598_v34 }
 0x3d8   : > { %v603_v28 = vsel %vm334_vm3, %v1098_v15, 0.0 }
 0x3d9   : > { %604 = vadd.xlane.f32.xlu0 %v603_v28 }
 0x3ed   : > { %1070 = vrot.lane.b32.xlu2 %v1450_v8, %s1291_s24  ;;  %s1227_s24 = scalar_lea.hbm %s1609_s4, 32 }
 0x3ee   : > { %p1229_p2 = scmp.lt.s32.totalorder %s1227_s24, %s1223_s8 }
 0x3f0   : > { %p1230_p9 = por %p1229_p2, %p1228_p11 }
 0x3f2   : > { %p1231_p10 = pnand %p1230_p9, %p1226_p8 }
 0x3f5   : > { %1080 = vrot.lane.b32.xlu2 %v1450_v8, %s1292_s23 }
 0x43c   : > { %v448_v16 = vpop.xlane.xlu1 %447 }
 0x440   : > { %v723_v29 = vpop.xlane.xlu2 %722 }
 0x441   : > { %v727_v30 = vsub.f32 %v719_v17, %v723_v29 }
 0x443   : > { %v729_v31 = vmul.f32 1.442695, %v727_v30 }
 0x444   : > { %v451_v39 = vpop.xlane.xlu0 %450 }
 0x445   : > { %1099 = vpow2.f32 %v729_v31 }
 0x446   : > { %1101 = vrcp.f32 %v448_v16 }
 0x448   : > { %v726_v20 = vpop.xlane.xlu2 %725 }
 0x449   : > { %v728_v33 = vsub.f32 %v720_v26, %v726_v20 }
 0x44b   : > { %v1100_v35 = vpop.eup %1099  ;;  %v731_v36 = vmul.f32 1.442695, %v728_v33 }
 0x44c   : > { %v733_v37 = vsel %vm334_vm3, %v1100_v35, 0.0  ;;  %v1102_v41 = vpop.eup %1101  ;;  %v605_v48 = vpop.xlane.xlu0 %604 }
 0x44d   : > { %1103 = vpow2.f32 %v731_v36  ;;  %734 = vadd.xlane.f32.xlu1 %v733_v37  ;;  %v454_v46 = vmul.f32 %v1102_v41, %v1094_v11 }
 0x44e   : > { %1105 = vpow2.f32 %v601_v38 }
 0x44f   : > { %1107 = vrcp.f32 %v451_v39 }
 0x450   : > { %v1071_v40 = vpop.permute.xlu2 %1070  ;;  %1109 = vrcp.f32 %v605_v48 }
 0x451   : > { %v1072_v42 = vunpack.i.l.bf16 %v1071_v40  ;;  %v1073_v44 = vunpack.i.h.bf16 %v1071_v40 }
 0x453   : > { %v1104_v43 = vpop.eup %1103  ;;  %482 = vmatpush.msrb.mxu2 %v1072_v42 }
 0x454   : > { %v736_v45 = vsel %vm334_vm3, %v1104_v43, 0.0  ;;  %v1106_v47 = vpop.eup %1105 }
 0x455   : > { %737 = vadd.xlane.f32.xlu0 %v736_v45  ;;  %483 = vmatpush.msrb.mxu2 %v1073_v44  ;;  %v1108_v50 = vpop.eup %1107  ;;  %v606_v53 = vsel %vm334_vm3, %v1106_v47, 0.0 }
 0x456   : > { %951 = vmatmul.msk.f32.vlgmr.msrb.gmra.mxu2 %vm334_vm3, %v454_v46  ;;  %v455_v54 = vmul.f32 %v1108_v50, %v1096_v22  ;;  %v1110_v55 = vpop.eup %1109 }
 0x457   : > { %v611_v56 = vmul.f32 %v1110_v55, %v1098_v15 }
 0x458   : > { %v1081_v49 = vpop.permute.xlu2 %1080 }
 0x459   : > { %v1082_v51 = vunpack.i.l.bf16 %v1081_v49  ;;  %v1083_v52 = vunpack.i.h.bf16 %v1081_v49 }
 0x45b   : > { %639 = vmatpush.msra.mxu2 %v1082_v51 }
 0x45d   : > { %607 = vadd.xlane.f32.xlu0 %v606_v53  ;;  %640 = vmatpush.msra.mxu2 %v1083_v52 }
 0x45e   : > { %952 = vmatmul.msk.f32.gmra.mxu2 %vm334_vm3, %v455_v54 }
 0x45f   : > { %800 = vmatpush.msrb.mxu2 %v778_v12 }
 0x466   : > { %1075 = vrot.lane.b32.xlu1 %v1450_v8, %s1293_s25  ;;  %961 = vmatmul.msk.f32.vlgmr.msra.gmra.mxu2 %vm334_vm3, %v611_v56 }
 0x4c0   : > { %v735_v60 = vpop.xlane.xlu1 %734 }
 0x4c8   : > { %v738_v58 = vpop.xlane.xlu0 %737 }
 0x4d0   : > { %v608_v61 = vpop.xlane.xlu0 %607 }
 0x4d1   : > { %1111 = vrcp.f32 %v608_v61 }
 0x4d2   : > { %1113 = vrcp.f32 %v735_v60 }
 0x4d3   : > { %1115 = vrcp.f32 %v738_v58 }
 0x4d7   : > { %v1112_v62 = vpop.eup %1111 }
 0x4d8   : > { %v1076_v63 = vpop.permute.xlu1 %1075  ;;  %v612_v0 = vmul.f32 %v1112_v62, %v1106_v47  ;;  %v1114_v1 = vpop.eup %1113 }
 0x4d9   : > { %v1077_v2 = vunpack.i.l.bf16 %v1076_v63  ;;  %v485_v4 = vpop.f32.mrf.mxu2  ;;  %v1078_v8 = vunpack.i.h.bf16 %v1076_v63  ;;  %v741_v5 = vmul.f32 %v1114_v1, %v1100_v35  ;;  %v1116_v6 = vpop.eup %1115 }
 0x4da   : > { %953 = vmatmul.msk.f32.vlgmr.msra.gmra.mxu0 %vm300_vm1, %v485_v4  ;;  %962 = vmatmul.msk.f32.gmra.mxu2 %vm334_vm3, %v612_v0  ;;  %v742_v10 = vmul.f32 %v1116_v6, %v1104_v43 }
 0x4db   : > { %769 = vmatpush.msra.mxu3 %v1077_v2 }
 0x4dd   : > { %770 = vmatpush.msra.mxu3 %v1078_v8 }
 0x4de   : > { %969 = vmatmul.msk.f32.vlgmr.msra.gmra.mxu3 %vm334_vm3, %v741_v5 }
 0x4e1   : > { %v488_v9 = vpop.f32.mrf.mxu2 }
 0x4e2   : > { %954 = vmatmul.msk.f32.gmra.mxu0 %vm300_vm1, %v488_v9 }
 0x4e6   : > { %970 = vmatmul.msk.f32.gmra.mxu3 %vm334_vm3, %v742_v10 }
 0x4e9   : > { %v642_v11 = vpop.f32.mrf.mxu2 }
 0x4ea   : > { %963 = vmatmul.msk.f32.vlgmr.msrb.gmra.mxu0 %vm300_vm1, %v642_v11 }
 0x557   : > { %v515_v18 = vpop.f32.mrf.mxu0 }
 0x558   : > { %v545_v22 = vadd.f32 %v1530_v3, %v515_v18 }
 0x55d   : > { %v645_v13 = vpop.f32.mrf.mxu2 }
 0x55e   : > { %964 = vmatmul.msk.f32.gmra.mxu0 %vm300_vm1, %v645_v13 }
 0x55f   : > { %v518_v19 = vpop.f32.mrf.mxu0 }
 0x560   : > { %v548_v28 = vadd.f32 %v1532_v7, %v518_v19 }
 0x561   : > { %v772_v14 = vpop.f32.mrf.mxu3 }
 0x562   : > { %971 = vmatmul.msk.f32.vlgmr.msrb.gmra.mxu2 %vm300_vm1, %v772_v14 }
 0x567   : > { %v672_v21 = vpop.f32.mrf.mxu0 }
 0x568   : > { %v678_v23 = vadd.f32 %v672_v21, %v545_v22 }
 0x569   : > { %v775_v17 = vpop.f32.mrf.mxu3 }
 0x56a   : > { %972 = vmatmul.msk.f32.gmra.mxu2 %vm300_vm1, %v775_v17 }
 0x5db   : > { %v675_v15 = vpop.f32.mrf.mxu0 }
 0x5dc   : > { %v679_v3 = vadd.f32 %v675_v15, %v548_v28 }
 0x5e5   : > { %v802_v25 = vpop.f32.mrf.mxu2 }
 0x5e6   : > { %v808_v26 = vadd.f32 %v802_v25, %v678_v23 }
 0x5e8   : > { %v814_v27 = vadd.f32 %v1084_v24, %v808_v26 }
 0x5ea   : > { %816 = vst.msk [vmem:[%s250_s6] sm:$0xff] %vm257_vm0, %v814_v27 }
 0x5ed   : > { %v805_v29 = vpop.f32.mrf.mxu2 }
 0x5ee   : > { %v809_v30 = vadd.f32 %v805_v29, %v679_v3 }
 0x5f0   : > { %v815_v31 = vadd.f32 %v1084_v24, %v809_v30 }
 0x5f2   : > { %817 = vst.msk [vmem:[%s250_s6 + $0x8] sm:$0xff] %vm257_vm0, %v815_v31 }
 0x5f3   : > { %1234 = shalt.err (!%p1231_p10)
}
 0x5f4   : > { %s1294_s20 = smov 128   ;;  %s1295_s27 = smov 8  }
 0x5f5   : > { %992 = dma.vmem_to_hbm [thread:$0]  (%p1393_p3), %s832_s7, 256, %s834_s30, %s819_s19, %s1294_s20, %s1294_s20, %s1295_s27  }
 0x5f6 PF: > { %s848_s28 = sand.u32 1, %s1265_s15   ;;  %p1615_p12 = scmp.ge.s32.totalorder %s1277_s18, 2 }
 0x5f7   : > { %s849_s11 = scalar_lea.sflag [#allocation4], %s848_s28 }
 0x5f8   : > { %p1006_p13 = pnand %p1615_p12, %p1356_p6 }
 0x5fa   : > { %p1007_p0 = pneg %p1006_p13 }
 0x5fc   : > { %1260 = dma.done.wait (%p1007_p0), %s849_s11, 256  }
 0x5fd   : > { %1262 = vsyncadd (%p1007_p0), %s849_s11, 4294967040  ;;  %p18_p5 = scmp.ge.s32.totalorder %s1383_s10, 4   ;;  %s1616_s15 = smov %s1269_s16 }
 0x5fe   : > { %s1617_s16 = smov %s1273_s17  ;;  %s1618_s17 = smov %s1399_s14 }
 0x5ff   : > { %s1619_s18 = smov %s1383_s10  ;;  %20 = sbr.rel (!%p18_p5) target bundleno = 6 (0x6), region = 89 }
 0x604   :  { %855 = vsyncpa [#allocation3], 1 }
 0x605   :  { %857 = vsyncpa [#allocation3 + $0x1], 1 }
 0x606   :  { %858 = vsyncpa [#allocation6], 1 }
 0x607   :  { %859 = vsyncpa [#allocation4], 1 }
 0x608   :  { %861 = vsyncpa [#allocation4 + $0x1], 1 }

</bundles_post_ra>
